<compile_context>
chip_gen: v7x
topology: tpu7x:2x2x1
jax: 0.10.0
libtpu: 0.0.40
codegen_flags: <defaults>
</compile_context>

<pallas_src>
import math
from functools import partial

import jax
import jax.numpy as jnp
from jax.experimental import pallas as pl
from jax.experimental.pallas import tpu as pltpu


def _round_up(x, m):
    return ((x + m - 1) // m) * m


def _token_conv_kernel(x_ref, w_ref, o_ref):
    """One (ts, d_model) output tile: a single fused-tap MXU dot.

    x_ref : (ts, kc_pad)       im2col input tile (3 taps concat on channels)
    w_ref : (kc_pad, d_model)  fused conv weights
    o_ref : (ts, d_model)      output tile
    """
    acc = jnp.dot(x_ref[...], w_ref[...], preferred_element_type=jnp.float32)
    o_ref[...] = acc.astype(o_ref.dtype)


def _vmem_capacity_bytes():
    """Physical VMEM capacity for this generation (conservative fallback)."""
    try:
        info = pltpu.get_tpu_info()
        cap = getattr(info, "vmem_capacity_bytes", None)
        if cap:
            return int(cap)
    except Exception:
        pass
    return 64 << 20          # v7x per-TC; safe lower bound for v5e/v6e too


def _choose_seq_tile(S, d_model, kc_pad, in_bytes, out_bytes, row_quantum,
                     vmem_budget):
    """Largest row tile (multiple of row_quantum, <= 2048) fitting the budget."""
    d_lane = _round_up(d_model, 128)
    kc_lane = _round_up(kc_pad, 128)
    # Double-buffered input + output tiles (lane-padded) + f32 accumulator.
    per_row = 2 * kc_lane * in_bytes + 2 * d_lane * out_bytes + d_lane * 4
    max_rows = max(row_quantum, vmem_budget // per_row)
    ts = int(min(2048, max_rows))
    ts = max(row_quantum, (ts // row_quantum) * row_quantum)
    # No point tiling beyond the (padded) sequence length.
    ts = min(ts, _round_up(S, row_quantum))
    return ts


def token_embedding(x, weight, *, seq_tile=None, compute_dtype=None,
                    out_dtype=None):
    """TokenEmbedding forward (circular Conv1d, kernel_size=3, no bias).

    x      : (B, S, c_in)
    weight : (d_model, c_in, 3)   PyTorch Conv1d weight layout
    returns: (B, S, d_model) in `out_dtype` (default: x.dtype)
    """
    B, S, c_in = x.shape
    d_model, c_in_w, ksize = weight.shape
    assert c_in_w == c_in and ksize == 3

    compute_dtype = jnp.dtype(compute_dtype or x.dtype)
    out_dtype = jnp.dtype(out_dtype or x.dtype)
    in_bytes = compute_dtype.itemsize
    out_bytes = out_dtype.itemsize

    # ---- im2col in the wrapper ---------------------------------------------
    # y[b, t, :] = sum_k x[b, (t-1+k) mod S, :] @ W[:, :, k].T
    # Tap k=0 -> x[t-1], k=1 -> x[t], k=2 -> x[t+1]  (circular).
    x_im2col = jnp.concatenate(
        [jnp.roll(x, 1, axis=1), x, jnp.roll(x, -1, axis=1)], axis=-1
    )                                                        # (B, S, 3*c_in)

    # Fused weights: row index = k*c_in + c, matching the concat order above.
    w_fused = jnp.transpose(weight, (2, 1, 0)).reshape(3 * c_in, d_model)

    # Pad the contraction dim to the compute-dtype sublane multiple (zero
    # channels contribute nothing).
    kc = 3 * c_in
    sub = 16 if in_bytes == 2 else 8
    kc_pad = _round_up(kc, sub)
    if kc_pad != kc:
        x_im2col = jnp.pad(x_im2col, ((0, 0), (0, 0), (0, kc_pad - kc)))
        w_fused = jnp.pad(w_fused, ((0, kc_pad - kc), (0, 0)))

    x_im2col = x_im2col.astype(compute_dtype)
    w_fused = w_fused.astype(compute_dtype)

    # ---- sequence tiling -----------------------------------------------------
    row_quantum = 16 if (in_bytes == 2 or out_bytes == 2) else 8
    vmem_cap = _vmem_capacity_bytes()
    if seq_tile is None:
        ts = _choose_seq_tile(S, d_model, kc_pad, in_bytes, out_bytes,
                              row_quantum, vmem_budget=int(0.35 * vmem_cap))
    else:
        ts = int(seq_tile)
        assert ts % row_quantum == 0, (
            f"seq_tile must be a multiple of {row_quantum}")

    # Pad S up to a multiple of ts (never tiny tiles, never ts = S fallback);
    # padded rows produce zeros and are sliced off below.
    S_pad = _round_up(S, ts)
    if S_pad != S:
        x_im2col = jnp.pad(x_im2col, ((0, 0), (0, S_pad - S), (0, 0)))
    n_seq_tiles = S_pad // ts

    # ---- VMEM limit: lane-padded footprint, generation-aware cap ------------
    d_lane = _round_up(d_model, 128)
    kc_lane = _round_up(kc_pad, 128)
    footprint = (
        2 * ts * kc_lane * in_bytes        # input tile, double-buffered
        + 2 * kc_pad * d_lane * in_bytes   # fused weights (constant block idx)
        + 2 * ts * d_lane * out_bytes      # output tile, double-buffered
        + ts * d_lane * 4                  # f32 accumulator
    )
    vmem_limit = int(min(0.75 * vmem_cap, max(32 << 20, 2 * footprint)))
    vmem_limit = max(vmem_limit, min(vmem_cap, footprint + (2 << 20)))

    out = pl.pallas_call(
        _token_conv_kernel,
        out_shape=jax.ShapeDtypeStruct((B, S_pad, d_model), out_dtype),
        grid_spec=pltpu.PrefetchScalarGridSpec(
            num_scalar_prefetch=0,
            grid=(B, n_seq_tiles),
            in_specs=[
                # im2col input: ordinary non-overlapping S tiles.
                pl.BlockSpec((None, ts, kc_pad), lambda b, s: (b, s, 0)),
                # Fused weights: constant block index -> loaded once.
                pl.BlockSpec((kc_pad, d_model), lambda b, s: (0, 0)),
            ],
            out_specs=pl.BlockSpec((None, ts, d_model), lambda b, s: (b, s, 0)),
        ),
        compiler_params=pltpu.CompilerParams(
            dimension_semantics=("parallel", "parallel"),
            vmem_limit_bytes=vmem_limit,
        ),
    )(x_im2col, w_fused)

    if S_pad != S:
        out = out[:, :S, :]
    return out


def kaiming_normal_conv1d(key, d_model, c_in, ksize=3, negative_slope=0.01):
    """kaiming_normal_(mode='fan_in', nonlinearity='leaky_relu') for Conv1d."""
    fan_in = c_in * ksize
    gain = math.sqrt(2.0 / (1.0 + negative_slope ** 2))
    std = gain / math.sqrt(fan_in)
    return std * jax.random.normal(key, (d_model, c_in, ksize), dtype=jnp.float32)


def token_embedding_ref(x, weight):
    """Pure-JAX reference of the circular Conv1d (kernel_size=3, no bias)."""
    B, S, C = x.shape
    xp = jnp.concatenate([x[:, -1:, :], x, x[:, :1, :]], axis=1)   # (B, S+2, C)
    out = jnp.zeros((B, S, weight.shape[0]), dtype=jnp.float32)
    for k in range(3):
        out = out + jnp.einsum('bsc,dc->bsd', xp[:, k:k + S, :], weight[:, :, k])
    return out


if __name__ == "__main__":
    B, S, c_in, d_model = 2, 32, 4, 32

    key = jax.random.PRNGKey(0)
    kx, kw = jax.random.split(key)
    x = jax.random.normal(kx, (B, S, c_in), dtype=jnp.float32)
    W = kaiming_normal_conv1d(kw, d_model, c_in)
    ref = token_embedding_ref(x, W)

    # 1) f32 path, explicit tile -> multi-step grid (B, 2).
    out = jax.block_until_ready(token_embedding(x, W, seq_tile=16))
    assert out.shape == (B, S, d_model)
    assert jnp.allclose(out, ref, atol=1e-5, rtol=1e-5)

    # 2) S not divisible by the tile exercises the pad-and-slice path.
    S2 = 24
    x2 = x[:, :S2, :]
    out2 = jax.block_until_ready(token_embedding(x2, W, seq_tile=16))
    assert out2.shape == (B, S2, d_model)
    assert jnp.allclose(out2, token_embedding_ref(x2, W), atol=1e-5, rtol=1e-5)

    # 3) bf16 operands + bf16 output (the bandwidth-bound fast path).
    out_bf16 = jax.block_until_ready(
        token_embedding(x, W, compute_dtype=jnp.bfloat16, out_dtype=jnp.bfloat16))
    assert out_bf16.dtype == jnp.bfloat16
    assert jnp.allclose(out_bf16.astype(jnp.float32), ref, atol=1e-1, rtol=5e-2)

    print("KERNEL_OK")
</pallas_src>

<mosaic_0001>
module attributes {stable_mosaic.version = 11 : i64} {
  func.func @_token_conv_kernel(%arg0: i32, %arg1: i32, %arg2: memref<1x16x16xf32, #tpu.memory_space<vmem>>, %arg3: memref<16x32xf32, #tpu.memory_space<vmem>>, %arg4: memref<1x16x32xf32, #tpu.memory_space<vmem>>) attributes {dimension_semantics = [#tpu.dimension_semantics<parallel>, #tpu.dimension_semantics<parallel>], iteration_bounds = array<i64: 2, 2>, scalar_prefetch = 0 : i64, scratch_operands = 0 : i64, tpu.core_type = #tpu.core_type<tc>, window_params = [{transform_indices = @transform_0, window_bounds = array<i64: 1, 16, 16>}, {pipeline_mode = #tpu.pipeline_mode<synchronous>, transform_indices = @transform_1, window_bounds = array<i64: 16, 32>}, {transform_indices = @transform_2, window_bounds = array<i64: 1, 16, 32>}]} {
    %c0 = arith.constant 0 : index
    %c0_0 = arith.constant 0 : index
    %c0_1 = arith.constant 0 : index
    %0 = vector.load %arg2[%c0, %c0_0, %c0_1] : memref<1x16x16xf32, #tpu.memory_space<vmem>>, vector<1x16x16xf32>
    %1 = vector.shape_cast %0 : vector<1x16x16xf32> to vector<16x16xf32>
    %c0_2 = arith.constant 0 : index
    %c0_3 = arith.constant 0 : index
    %2 = vector.load %arg3[%c0_2, %c0_3] : memref<16x32xf32, #tpu.memory_space<vmem>>, vector<16x32xf32>
    %cst = arith.constant dense<0.000000e+00> : vector<16x32xf32>
    %3 = tpu.matmul %1, %2, %cst {dimension_numbers = #tpu.dot_dimension_numbers<[1], [0], [0], [1], [0, 0, 1, 1], [], []>} : vector<16x16xf32>, vector<16x32xf32>, vector<16x32xf32> -> vector<16x32xf32>
    %c0_4 = arith.constant 0 : index
    %c0_5 = arith.constant 0 : index
    %c0_6 = arith.constant 0 : index
    %4 = vector.load %arg4[%c0_4, %c0_5, %c0_6] : memref<1x16x32xf32, #tpu.memory_space<vmem>>, vector<1x16x32xf32>
    %5 = vector.shape_cast %4 : vector<1x16x32xf32> to vector<16x32xf32>
    %6 = vector.shape_cast %3 : vector<16x32xf32> to vector<1x16x32xf32>
    tpu.vector_store %arg4[%c0_4, %c0_5, %c0_6], %6 {strides = array<i32>} : memref<1x16x32xf32, #tpu.memory_space<vmem>>, vector<1x16x32xf32>,
    return
  }
  func.func @transform_0(%arg0: i32, %arg1: i32) -> (i32, i32, i32) {
    %c0_i32 = arith.constant 0 : i32
    %c0_i32_0 = arith.constant 0 : i32
    return %arg0, %arg1, %c0_i32 : i32, i32, i32
  }
  func.func @transform_1(%arg0: i32, %arg1: i32) -> (i32, i32) {
    %c0_i32 = arith.constant 0 : i32
    %c0_i32_0 = arith.constant 0 : i32
    %c0_i32_1 = arith.constant 0 : i32
    return %c0_i32, %c0_i32_0 : i32, i32
  }
  func.func @transform_2(%arg0: i32, %arg1: i32) -> (i32, i32, i32) {
    %c0_i32 = arith.constant 0 : i32
    %c0_i32_0 = arith.constant 0 : i32
    return %arg0, %arg1, %c0_i32 : i32, i32, i32
  }
}

</mosaic_0001>

<bundles_post_ra>
// kernel: tpu_custom_call.1
= control target key start
LH: loop header
LB: loop body
LE: loop exit
PB: predicated region body
PF: predicated region fallthrough
CT: control target
= control target key end

     0   :  { %7 = vsyncpa [#allocation3], 0  ;;  %s723_s0 = inlined_call_operand.vmem [shape: f32[2,32,16], index: 0, kind: input, shape index: {}]   ;;  %s724_s1 = inlined_call_operand.vmem [shape: f32[16,32], index: 1, kind: input, shape index: {}]   ;;  %s725_s2 = inlined_call_operand.hbm [shape: f32[2,32,32], index: 2, kind: output, shape index: {}]  }
   0x1   :  { %9 = vsyncpa [#allocation3 + $0x1], 0  ;;  %s579_s9 = smov 0   ;;  %s581_s10 = smov 0  }
   0x2   :  { %s583_s11 = smov 0   ;;  %s585_s12 = smov 0  }
   0x3   :  { %s587_s13 = smov 0   ;;  %s589_s14 = smov 0  }
   0x4   :  { %s591_s15 = smov 0   ;;  %s593_s16 = smov 0  }
   0x5 LB: > { %s360_s17 = sadd.s32 4294967295, %s559_s16   ;;  %s361_s18 = sadd.s32 4294967294, %s559_s16   ;;  %s559_s16 = sphi %s593_s16, %s15_s16   ;;  %s555_s15 = sphi %s591_s15, %s734_s15   ;;  %s551_s14 = sphi %s589_s14, %s733_s14   ;;  %s547_s13 = sphi %s587_s13, %s732_s13   ;;  %s543_s12 = sphi %s585_s12, %s731_s12   ;;  %s539_s11 = sphi %s583_s11, %s730_s11   ;;  %s535_s10 = sphi %s581_s10, %s729_s10   ;;  %s531_s9 = sphi %s579_s9, %s728_s9  }
   0x6   : > { %s24_s19 = sadd.s32 1, %s551_s14  ;;  %s27_s20 = sadd.s32 1, %s555_s15 }
   0x7   : > { %p25_p0 = scmp.ge.s32.totalorder %s24_s19, 2  ;;  %p95_p1 = scmp.ne.s32.totalorder %s539_s11, %s535_s10 }
   0x8   : > { %p96_p2 = scmp.eq.s32.totalorder %s360_s17, 3  ;;  %p101_p5 = scmp.ne.s32.totalorder %s535_s10, %s531_s9 }
   0x9   : > { %s736_s19 = smov (%p25_p0, %s24_s19), 0  ;;  %s738_s20 = smov (!%p25_p0, %s27_s20), %s555_s15 }
   0xa   : > { %s81_s21 = ssub.s32 %s551_s14, %s736_s19  ;;  %p630_p3 = por %p96_p2, %p95_p1 }
   0xb   : > { %p29_p4 = scmp.ge.s32.totalorder %s738_s20, 2  ;;  %p102_p6 = scmp.eq.s32.totalorder %s361_s18, 3 }
   0xc   : > { %p364_p7 = scmp.ge.s32.totalorder %s559_s16, 1  ;;  %p136_p9 = scmp.lt.s32.totalorder %s559_s16, 5 }
   0xd   : > { %s740_s20 = smov (%p29_p4, %s738_s20), 0  ;;  %p639_p8 = por %p102_p6, %p101_p5 }
   0xe   : > { %s80_s24 = ssub.s32 %s555_s15, %s740_s20  ;;  %s85_s25 = sadd.s32 1, %s539_s11 }
   0xf   : > { %s82_s26 = sor.u32 %s81_s21, %s80_s24  ;;  %p137_p10 = pnand %p364_p7, %p136_p9 }
  0x10   : > { %p83_p11 = scmp.eq.s32.totalorder %s82_s26, 0  ;;  %v175_v0 = vld [vmem:[%s724_s1] sm:$0xff] (!%p137_p10)  ;;  %v176_v1 = vld [vmem:[%s724_s1 + $0x8] sm:$0xff] (!%p137_p10)  ;;  %s366_s4 = sshll.u32 (!%p137_p10), %s543_s12, 1  ;;  %vm177_vm0 = vcmask (!%p137_p10), 130048   ;;  %vm259_vm1 = vcmask (!%p137_p10), 261120  }
  0x11   : > { %140 = sbr.rel (%p137_p10) target bundleno = 260 (0x104), region = 28  ;;  %p163_p12 = scmp.lt.s32.totalorder (!%p137_p10), %s547_s13, 1  ;;  %v388_v2 = vpack.c.bf16 (!%p137_p10), %v176_v1, %v175_v0 }
  0x12   : > { %s648_s27 = scalar_select %p83_p11, %s539_s11, %s85_s25  }
  0x13   : > { %p165_p13 = scmp.lt.s32.totalorder (!%p137_p10), %s366_s4, 3  ;;  %389 = vmatprep.subr.bf16.mxu0 (!%p137_p10), %v388_v2  ;;  %s159_s12 = sand.u32 (!%p137_p10), 1, %s535_s10  }
  0x14   : > { %391 = vmatpush3.bf16.msra.mxu0 (!%p137_p10), %v388_v2  ;;  %s373_s25 = sshll.u32 (!%p137_p10), %s547_s13, 2  ;;  %s365_s26 = sshll.u32 (!%p137_p10), %s159_s12, 4 }
  0x15   : > { %s275_s28 = sadd.s32 (!%p137_p10), %s373_s25, %s366_s4  ;;  %s161_s30 = scalar_lea.vmem (!%p137_p10), [#allocation2], %s365_s26 }
  0x16   : > { %s374_s29 = sshll.u32 (!%p137_p10), %s275_s28, 7  ;;  %s278_s3 = sshll.u32 (!%p137_p10), %s161_s30, 4  ;;  %s669_s3 = int_to_ptr.vmem [resolvable:$true] %s278_s3 }
  0x18   : > { %s164_s5 = scalar_select %p163_p12, %s547_s13, 1 }
  0x19   : > { %s166_s6 = scalar_select %p165_p13, %s366_s4, 3 }
  0x1a   : > { %s367_s7 = sshll.u32 %s164_s5, 2  ;;  %s671_s13 = scalar_lea.sflag [#allocation3], %s159_s12 }
  0x1b   : > { %s168_s8 = sadd.s32 %s367_s7, %s166_s6  ;;  %s667_s7 = scalar_lea.hbm %s725_s2, %s374_s29 }
  0x1c   : > { %s368_s17 = sshll.u32 %s168_s8, 3  ;;  %s465_s4 = scalar_lea.vmem %s669_s3, 256 }
  0x1d   : > { %s170_s24 = scalar_lea.vmem %s723_s0, %s368_s17  ;;  %p466_p0 = scmp.ne.s32.totalorder %s669_s3, %s465_s4 }
  0x1e   : > { %v173_v3 = vld [vmem:[%s170_s24] sm:$0xff]  ;;  %v174_v4 = vld [vmem:[%s170_s24 + $0x8] sm:$0xff]  ;;  %s561_s8 = smov [#allocation2]  }
  0x1f   : > { %385 = vmatprep.mubr.msk.f32.mxu0 %vm177_vm0, %v173_v3  ;;  %p467_p1 = pnand %p466_p0, %p630_p3  ;;  %s469_s17 = sshll.u32 %s561_s8, 4  ;;  %s470_s17 = int_to_ptr.vmem [resolvable:$false] %s469_s17 }
  0x20   : > { %386 = vmatmul.mubr.msk.f32.vlgmr.msra.gmra.mrb[0].mxu0 %vm177_vm0, %v174_v4  ;;  %s471_s18 = scalar_lea.vmem %s470_s17, 512  ;;  %p472_p4 = scmp.lt.s32.totalorder %s669_s3, %s470_s17 }
  0x21   : > { %p468_p2 = pneg %p467_p1  ;;  %p473_p5 = scmp.lt.s32.totalorder %s471_s18, %s465_s4 }
  0x23   : > { %p474_p6 = por %p473_p5, %p472_p4 }
  0x25   : > { %p475_p7 = pnand %p474_p6, %p468_p2 }
  0xf3   : > { %v387_v5 = vpop.f32.mrb[0].mxu0 }
  0xf4   : > { %261 = vst.msk [vmem:[%s161_s30 + $0x8] sm:$0xff] %vm259_vm1, %v387_v5  ;;  %v250_v6 = vpop.f32.mrb[1].mxu0 }
  0xf5   : > { %260 = vst.msk [vmem:[%s161_s30] sm:$0xff] %vm259_vm1, %v250_v6 }
  0xf6   : > { %478 = shalt.err (!%p475_p7)
}
  0xf7   : > { %s479_s21 = scalar_lea.hbm %s667_s7, 256  ;;  %s483_s25 = scalar_lea.hbm %s725_s2, 1024 }
  0xf8   : > { %p480_p9 = scmp.ne.s32.totalorder %s667_s7, %s479_s21  ;;  %p484_p12 = scmp.lt.u32.totalorder %s667_s7, %s725_s2 }
  0xf9   : > { %p485_p13 = scmp.lt.u32.totalorder %s483_s25, %s479_s21  ;;  %p487_p1 = scmp.lt.u32.totalorder %s479_s21, %s667_s7 }
  0xfa   : > { %p481_p10 = pnand %p480_p9, %p630_p3 }
  0xfb   : > { %p486_p0 = por %p485_p13, %p484_p12 }
  0xfc   : > { %p482_p11 = pneg %p481_p10 }
  0xfd   : > { %p488_p2 = por %p487_p1, %p486_p0 }
  0xff   : > { %p489_p4 = pnand %p488_p2, %p482_p11 }
 0x101   : > { %492 = shalt.err (!%p489_p4)
}
 0x102   : > { %s562_s29 = smov 128   ;;  %s563_s30 = smov 8  }
 0x103   : > { %392 = dma.vmem_to_hbm [thread:$0]  (%p630_p3), %s669_s3, 256, %s667_s7, %s671_s13, %s562_s29, %s562_s29, %s563_s30  }
 0x104 PF: > { %p398_p5 = scmp.ge.s32.totalorder %s559_s16, 2  ;;  %s293_s5 = sand.u32 1, %s531_s9  }
 0x105   : > { %s294_s6 = scalar_lea.sflag [#allocation3], %s293_s5 }
 0x106   : > { %p395_p6 = pnand %p398_p5, %p639_p8 }
 0x108   : > { %526 = dma.done.wait (!%p395_p6), %s294_s6, 256  }
 0x109   : > { %528 = vsyncadd (!%p395_p6), %s294_s6, 4294967040  ;;  %s15_s16 = sadd.s32 1, %s559_s16   ;;  %s728_s9 = smov %s535_s10 }
 0x10a   : > { %p12_p7 = scmp.ge.s32.totalorder %s15_s16, 6   ;;  %s729_s10 = smov %s539_s11 }
 0x10b   : > { %s730_s11 = smov %s648_s27  ;;  %s731_s12 = smov %s551_s14 }
 0x10c   : > { %s732_s13 = smov %s555_s15  ;;  %s733_s14 = smov %s736_s19 }
 0x10d   : > { %s734_s15 = smov %s740_s20  ;;  %14 = sbr.rel (!%p12_p7) target bundleno = 5 (0x5), region = 63 }
 0x114   :  { %299 = vsyncpa [#allocation3], 1 }
 0x115   :  { %301 = vsyncpa [#allocation3 + $0x1], 1 }

</bundles_post_ra>
